<compile_context>
chip_gen: v6e
topology: v6e:2x2x1
jax: 0.10.0
libtpu: 0.0.40
codegen_flags: <defaults>
</compile_context>

<pallas_src>
import jax
import jax.numpy as jnp
from jax.experimental import pallas as pl
from jax.experimental.pallas import tpu as pltpu

IN_FEATURES = 28 * 28   # 784
HIDDEN = 512
OUT_FEATURES = 10
OUT_PAD = 128           # lane-dense padded output width


def mlp_kernel(x_ref, w1_ref, b1_ref, w2_ref, b2_ref, o_ref):
    # x_ref : (TB, 784)  bf16     w1_ref: (784, 512) bf16    b1_ref: (1, 512) f32
    # w2_ref: (512, 128) bf16     b2_ref: (1, 128)   f32     o_ref : (TB, 128) f32
    x = x_ref[...]
    # fc1 + bias + ReLU (MXU matmul, f32 accumulation; bias/ReLU on VPU)
    h = jnp.dot(x, w1_ref[...], preferred_element_type=jnp.float32)
    h = jnp.maximum(h + b1_ref[...], 0.0)
    # fc2 (bf16 operands again, f32 accumulation), lane-dense padded output
    h = h.astype(jnp.bfloat16)
    o = jnp.dot(h, w2_ref[...], preferred_element_type=jnp.float32)
    o_ref[...] = (o + b2_ref[...]).astype(o_ref.dtype)


def clothing_classifier_forward(x_nchw, w1, b1, w2, b2, block_rows=1024):
    """x_nchw: (B, 1, 28, 28) float32. Returns logits (B, 10) float32."""
    B = x_nchw.shape[0]
    # nn.Flatten: flatten everything after the batch dim (row-major, as torch).
    x = x_nchw.reshape(B, IN_FEATURES).astype(jnp.float32)

    # Batch tile: multiple of 8 sublanes, capped so the bf16 x tile (+ double
    # buffering) comfortably fits scoped VMEM on all TPU generations.
    TB = min(block_rows, max(8, ((B + 7) // 8) * 8))
    TB = ((TB + 7) // 8) * 8
    Bp = ((B + TB - 1) // TB) * TB
    if Bp != B:
        x = jnp.pad(x, ((0, Bp - B), (0, 0)))

    # bf16 matmul operands, f32 biases / accumulation.
    x_bf = x.astype(jnp.bfloat16)
    w1_bf = w1.astype(jnp.bfloat16)
    b1_f = b1.reshape(1, HIDDEN).astype(jnp.float32)
    # Zero-pad fc2 to 128 output lanes.
    w2_bf = jnp.zeros((HIDDEN, OUT_PAD), jnp.bfloat16)
    w2_bf = w2_bf.at[:, :OUT_FEATURES].set(w2.astype(jnp.bfloat16))
    b2_f = jnp.zeros((1, OUT_PAD), jnp.float32)
    b2_f = b2_f.at[:, :OUT_FEATURES].set(b2.reshape(1, OUT_FEATURES).astype(jnp.float32))

    grid = (Bp // TB,)
    out = pl.pallas_call(
        mlp_kernel,
        out_shape=jax.ShapeDtypeStruct((Bp, OUT_PAD), jnp.float32),
        grid=grid,
        in_specs=[
            pl.BlockSpec((TB, IN_FEATURES), lambda i: (i, 0)),      # batch-tiled x
            pl.BlockSpec((IN_FEATURES, HIDDEN), lambda i: (0, 0)),  # resident weights
            pl.BlockSpec((1, HIDDEN), lambda i: (0, 0)),
            pl.BlockSpec((HIDDEN, OUT_PAD), lambda i: (0, 0)),
            pl.BlockSpec((1, OUT_PAD), lambda i: (0, 0)),
        ],
        out_specs=pl.BlockSpec((TB, OUT_PAD), lambda i: (i, 0)),
        compiler_params=pltpu.CompilerParams(
            dimension_semantics=("parallel",),
        ),
    )(x_bf, w1_bf, b1_f, w2_bf, b2_f)

    return out[:B, :OUT_FEATURES]


def init_params(key):
    """Deterministic init mimicking PyTorch nn.Linear default (uniform +/- 1/sqrt(fan_in))."""
    k1, k2, k3, k4 = jax.random.split(key, 4)
    fan1 = IN_FEATURES
    fan2 = HIDDEN
    bound1 = 1.0 / jnp.sqrt(fan1)
    bound2 = 1.0 / jnp.sqrt(fan2)
    # Stored as (in_features, out_features) so the kernel does x @ W (== x @ W_torch.T).
    w1 = jax.random.uniform(k1, (fan1, HIDDEN), jnp.float32, -bound1, bound1)
    b1 = jax.random.uniform(k2, (1, HIDDEN), jnp.float32, -bound1, bound1)
    w2 = jax.random.uniform(k3, (fan2, OUT_FEATURES), jnp.float32, -bound2, bound2)
    b2 = jax.random.uniform(k4, (1, OUT_FEATURES), jnp.float32, -bound2, bound2)
    return w1, b1, w2, b2


if __name__ == "__main__":
    key = jax.random.PRNGKey(0)
    kx, kp = jax.random.split(key)

    # Small NCHW input consistent with the module: batch=2, 1 channel, 28x28 images.
    x = jax.random.normal(kx, (2, 1, 28, 28), dtype=jnp.float32)
    w1, b1, w2, b2 = init_params(kp)

    logits = clothing_classifier_forward(x, w1, b1, w2, b2)
    logits = jax.block_until_ready(logits)

    # Reference check in plain f32 JAX (kernel uses bf16 operands with f32
    # accumulation, so tolerance is loosened accordingly).
    xf = x.reshape(2, IN_FEATURES)
    ref = jnp.maximum(xf @ w1 + b1, 0.0) @ w2 + b2
    assert logits.shape == (2, OUT_FEATURES)
    assert jnp.allclose(logits, ref, atol=3e-2, rtol=3e-2), "mismatch vs reference"

    print("KERNEL_OK")
</pallas_src>

<mosaic_0001>
module attributes {stable_mosaic.version = 11 : i64} {
  func.func @mlp_kernel(%arg0: i32, %arg1: memref<8x784xbf16, #tpu.memory_space<vmem>>, %arg2: memref<784x512xbf16, #tpu.memory_space<vmem>>, %arg3: memref<1x512xf32, #tpu.memory_space<vmem>>, %arg4: memref<512x128xbf16, #tpu.memory_space<vmem>>, %arg5: memref<1x128xf32, #tpu.memory_space<vmem>>, %arg6: memref<8x128xf32, #tpu.memory_space<vmem>>) attributes {dimension_semantics = [#tpu.dimension_semantics<parallel>], iteration_bounds = array<i64: 1>, scalar_prefetch = 0 : i64, scratch_operands = 0 : i64, tpu.core_type = #tpu.core_type<tc>, window_params = [{transform_indices = @transform_0, window_bounds = array<i64: 8, 784>}, {pipeline_mode = #tpu.pipeline_mode<synchronous>, transform_indices = @transform_1, window_bounds = array<i64: 784, 512>}, {pipeline_mode = #tpu.pipeline_mode<synchronous>, transform_indices = @transform_2, window_bounds = array<i64: 1, 512>}, {pipeline_mode = #tpu.pipeline_mode<synchronous>, transform_indices = @transform_3, window_bounds = array<i64: 512, 128>}, {pipeline_mode = #tpu.pipeline_mode<synchronous>, transform_indices = @transform_4, window_bounds = array<i64: 1, 128>}, {transform_indices = @transform_5, window_bounds = array<i64: 8, 128>}]} {
    %c0 = arith.constant 0 : index
    %c0_0 = arith.constant 0 : index
    %0 = vector.load %arg1[%c0, %c0_0] : memref<8x784xbf16, #tpu.memory_space<vmem>>, vector<8x784xbf16>
    %c0_1 = arith.constant 0 : index
    %c0_2 = arith.constant 0 : index
    %1 = vector.load %arg2[%c0_1, %c0_2] : memref<784x512xbf16, #tpu.memory_space<vmem>>, vector<784x512xbf16>
    %cst = arith.constant dense<0.000000e+00> : vector<8x512xf32>
    %2 = tpu.matmul %0, %1, %cst {dimension_numbers = #tpu.dot_dimension_numbers<[1], [0], [0], [1], [0, 0, 1, 1], [], []>} : vector<8x784xbf16>, vector<784x512xbf16>, vector<8x512xf32> -> vector<8x512xf32>
    %c0_3 = arith.constant 0 : index
    %c0_4 = arith.constant 0 : index
    %3 = vector.load %arg3[%c0_3, %c0_4] : memref<1x512xf32, #tpu.memory_space<vmem>>, vector<1x512xf32>
    %4 = vector.broadcast %3 : vector<1x512xf32> to vector<8x512xf32>
    %5 = arith.addf %2, %4 : vector<8x512xf32>
    %cst_5 = arith.constant 0.000000e+00 : f32
    %6 = vector.broadcast %cst_5 : f32 to vector<8x512xf32>
    %7 = arith.maximumf %5, %6 : vector<8x512xf32>
    %8 = arith.truncf %7 : vector<8x512xf32> to vector<8x512xbf16>
    %c0_6 = arith.constant 0 : index
    %c0_7 = arith.constant 0 : index
    %9 = vector.load %arg4[%c0_6, %c0_7] : memref<512x128xbf16, #tpu.memory_space<vmem>>, vector<512x128xbf16>
    %cst_8 = arith.constant dense<0.000000e+00> : vector<8x128xf32>
    %10 = tpu.matmul %8, %9, %cst_8 {dimension_numbers = #tpu.dot_dimension_numbers<[1], [0], [0], [1], [0, 0, 1, 1], [], []>} : vector<8x512xbf16>, vector<512x128xbf16>, vector<8x128xf32> -> vector<8x128xf32>
    %c0_9 = arith.constant 0 : index
    %c0_10 = arith.constant 0 : index
    %11 = vector.load %arg5[%c0_9, %c0_10] : memref<1x128xf32, #tpu.memory_space<vmem>>, vector<1x128xf32>
    %12 = vector.broadcast %11 : vector<1x128xf32> to vector<8x128xf32>
    %13 = arith.addf %10, %12 : vector<8x128xf32>
    %c0_11 = arith.constant 0 : index
    %c0_12 = arith.constant 0 : index
    %14 = vector.load %arg6[%c0_11, %c0_12] : memref<8x128xf32, #tpu.memory_space<vmem>>, vector<8x128xf32>
    tpu.vector_store %arg6[%c0_11, %c0_12], %13 {strides = array<i32>} : memref<8x128xf32, #tpu.memory_space<vmem>>, vector<8x128xf32>,
    return
  }
  func.func @transform_0(%arg0: i32) -> (i32, i32) {
    %c0_i32 = arith.constant 0 : i32
    %c0_i32_0 = arith.constant 0 : i32
    return %arg0, %c0_i32 : i32, i32
  }
  func.func @transform_1(%arg0: i32) -> (i32, i32) {
    %c0_i32 = arith.constant 0 : i32
    %c0_i32_0 = arith.constant 0 : i32
    %c0_i32_1 = arith.constant 0 : i32
    return %c0_i32, %c0_i32_0 : i32, i32
  }
  func.func @transform_2(%arg0: i32) -> (i32, i32) {
    %c0_i32 = arith.constant 0 : i32
    %c0_i32_0 = arith.constant 0 : i32
    %c0_i32_1 = arith.constant 0 : i32
    return %c0_i32, %c0_i32_0 : i32, i32
  }
  func.func @transform_3(%arg0: i32) -> (i32, i32) {
    %c0_i32 = arith.constant 0 : i32
    %c0_i32_0 = arith.constant 0 : i32
    %c0_i32_1 = arith.constant 0 : i32
    return %c0_i32, %c0_i32_0 : i32, i32
  }
  func.func @transform_4(%arg0: i32) -> (i32, i32) {
    %c0_i32 = arith.constant 0 : i32
    %c0_i32_0 = arith.constant 0 : i32
    %c0_i32_1 = arith.constant 0 : i32
    return %c0_i32, %c0_i32_0 : i32, i32
  }
  func.func @transform_5(%arg0: i32) -> (i32, i32) {
    %c0_i32 = arith.constant 0 : i32
    %c0_i32_0 = arith.constant 0 : i32
    return %arg0, %c0_i32 : i32, i32
  }
}

</mosaic_0001>

<bundles_post_ra>
// kernel: tpu_custom_call.1
= control target key start
LH: loop header
LB: loop body
LE: loop exit
PB: predicated region body
PF: predicated region fallthrough
CT: control target
= control target key end

     0   :  { %10 = vsyncpa [#allocation3], 0  ;;  %s2829_s0 = inlined_call_operand.hbm [shape: bf16[8,784], index: 0, kind: input, shape index: {}]   ;;  %s2830_s1 = inlined_call_operand.hbm [shape: bf16[784,512], index: 1, kind: input, shape index: {}]   ;;  %s2831_s2 = inlined_call_operand.hbm [shape: f32[1,512], index: 2, kind: input, shape index: {}]   ;;  %s2832_s3 = inlined_call_operand.hbm [shape: bf16[512,128], index: 3, kind: input, shape index: {}]   ;;  %s2833_s4 = inlined_call_operand.vmem [shape: f32[1,128], index: 4, kind: input, shape index: {}]   ;;  %s2834_s5 = inlined_call_operand.hbm [shape: f32[8,128], index: 5, kind: output, shape index: {}]  }
   0x1   :  { %11 = vsyncpa [#allocation6], 0 }
   0x2   :  { %12 = vsyncpa [#allocation9], 0 }
   0x3   :  { %13 = vsyncpa [#allocation4], 0  ;;  %s2733_s18 = smov [#allocation5]  }
   0x4   :  { %s29_s19 = sshll.u32 %s2733_s18, 4  ;;  %s30_s19 = int_to_ptr.vmem [resolvable:$true] %s29_s19 }
   0x5   :  { %s2633_s20 = scalar_lea.vmem %s30_s19, 25088  ;;  %p2638_p1 = scmp.lt.s32.totalorder %s30_s19, %s30_s19 }
   0x6   :  { %p2634_p0 = scmp.ne.s32.totalorder %s30_s19, %s2633_s20  ;;  %p2639_p2 = scmp.lt.s32.totalorder %s2633_s20, %s2633_s20 }
   0x8   :  { %p2640_p3 = por %p2639_p2, %p2638_p1 }
   0xa   :  { %p2641_p4 = pnand %p2640_p3, %p2634_p0 }
   0xc   :  { %2644 = shalt.err (!%p2641_p4)
}
   0xd   :  { %s2734_s21 = smov 256   ;;  %s2735_s22 = smov 16  }
   0xe   :  { %35 = dma.hbm_to_vmem [thread:$0]  %s2830_s1, 25088, %s30_s19, [#allocation6], %s2734_s21, %s2734_s21, %s2735_s22  }
   0xf   :  { %s2736_s25 = smov [#allocation2]   ;;  %s2737_s27 = smov [#allocation7]  }
  0x10   :  { %s20_s26 = sshll.u32 %s2736_s25, 4  ;;  %s42_s28 = sshll.u32 %s2737_s27, 4  ;;  %s21_s26 = int_to_ptr.vmem [resolvable:$true] %s20_s26  ;;  %s43_s28 = int_to_ptr.vmem [resolvable:$true] %s42_s28 }
  0x11   :  { %s2653_s29 = scalar_lea.vmem %s21_s26, 448  ;;  %p2658_p6 = scmp.lt.s32.totalorder %s21_s26, %s21_s26 }
  0x12   :  { %p2654_p5 = scmp.ne.s32.totalorder %s21_s26, %s2653_s29  ;;  %p2659_p7 = scmp.lt.s32.totalorder %s2653_s29, %s2653_s29 }
  0x14   :  { %p2660_p8 = por %p2659_p7, %p2658_p6 }
  0x16   :  { %p2661_p9 = pnand %p2660_p8, %p2654_p5 }
  0x18   :  { %2664 = shalt.err (!%p2661_p9)
}
  0x19   :  { %23 = dma.hbm_to_vmem [thread:$0]  %s2829_s0, 448, %s21_s26, [#allocation3]  }
  0x1a   :  { %s2673_s7 = scalar_lea.vmem %s43_s28, 64  ;;  %p2678_p11 = scmp.lt.s32.totalorder %s43_s28, %s43_s28 }
  0x1b   :  { %p2674_p10 = scmp.ne.s32.totalorder %s43_s28, %s2673_s7  ;;  %p2679_p12 = scmp.lt.s32.totalorder %s2673_s7, %s2673_s7 }
  0x1d   :  { %p2680_p13 = por %p2679_p12, %p2678_p11 }
  0x1f   :  { %p2681_p0 = pnand %p2680_p13, %p2674_p10 }
  0x21   :  { %2684 = shalt.err (!%p2681_p0)
}
  0x22   :  { %45 = dma.hbm_to_vmem [thread:$0]  %s2831_s2, 64, %s43_s28, [#allocation6]  }
  0x23   :  { %s2738_s9 = smov [#allocation8]  }
  0x24   :  { %s51_s10 = sshll.u32 %s2738_s9, 4  ;;  %s52_s10 = int_to_ptr.vmem [resolvable:$true] %s51_s10 }
  0x25   :  { %s2693_s11 = scalar_lea.vmem %s52_s10, 4096  ;;  %p2698_p2 = scmp.lt.s32.totalorder %s52_s10, %s52_s10 }
  0x26   :  { %p2694_p1 = scmp.ne.s32.totalorder %s52_s10, %s2693_s11  ;;  %p2699_p3 = scmp.lt.s32.totalorder %s2693_s11, %s2693_s11 }
  0x28   :  { %p2700_p4 = por %p2699_p3, %p2698_p2 }
  0x2a   :  { %p2701_p5 = pnand %p2700_p4, %p2694_p1 }
  0x2c   :  { %2704 = shalt.err (!%p2701_p5)
}
  0x2d   :  { %s2739_s0 = smov 64   ;;  %s2740_s12 = smov 4  }
  0x2e   :  { %57 = dma.hbm_to_vmem [thread:$0]  %s2832_s3, 4096, %s52_s10, [#allocation9], %s2739_s0, %s2739_s0, %s2740_s12  }
  0x2f   :  { %2725 = dma.done.wait [#allocation3], 448  }
  0x30   :  { %2726 = vsyncadd [#allocation3], 4294966848 }
  0x31   :  { %2727 = dma.done.wait [#allocation6], 25152  }
  0x32   :  { %2728 = vsyncadd [#allocation6], 4294942144 }
  0x33   :  { %2729 = dma.done.wait [#allocation9], 4096  }
  0x34   :  { %2730 = vsyncadd [#allocation9], 4294963200  ;;  %v2292_v0 = vld [vmem:[#allocation5 + $0xe4] ss:$16 sps:$4 sm:$0xff]   ;;  %v2296_v2 = vld [vmem:[#allocation5 + $0xe0] ss:$16 sps:$4 sm:$0xff]  }
  0x35   :  { %v2294_v1 = vld [vmem:[#allocation5 + $0x2e4] ss:$16 sps:$4 sm:$0xff]   ;;  %1303 = vmatprep.subr.bf16.mxu0 %v2292_v0  ;;  %v2297_v3 = vld [vmem:[#allocation5 + $0x2e0] ss:$16 sps:$4 sm:$0xff]   ;;  %vm1299_vm0 = vcmask 130048   ;;  %s2742_s15 = smov [#allocation10]  }
  0x36   :  { %1344 = vmatprep.subr.bf16.mxu1 %v2294_v1  ;;  %v2298_v4 = vld [vmem:[#allocation5 + $0xc4] ss:$16 sps:$4 sm:$0xff]   ;;  %1304 = vmatpush1.bf16.msra.mxu0 %v2296_v2  ;;  %v2302_v6 = vld [vmem:[#allocation5 + $0xc0] ss:$16 sps:$4 sm:$0xff]   ;;  %s1989_s16 = sshll.u32 %s2742_s15, 4  ;;  %s1990_s16 = int_to_ptr.vmem [resolvable:$true] %s1989_s16 }
  0x37   :  { %1345 = vmatpush1.bf16.msra.mxu1 %v2297_v3  ;;  %v2300_v5 = vld [vmem:[#allocation5 + $0x2c4] ss:$16 sps:$4 sm:$0xff]   ;;  %1305 = vmatprep.subr.bf16.mxu0 %v2298_v4  ;;  %v2303_v7 = vld [vmem:[#allocation5 + $0x2c0] ss:$16 sps:$4 sm:$0xff]   ;;  %s2705_s17 = scalar_lea.vmem %s1990_s16, 128  ;;  %p2710_p7 = scmp.lt.s32.totalorder %s1990_s16, %s1990_s16 }
  0x38   :  { %1346 = vmatprep.subr.bf16.mxu1 %v2300_v5  ;;  %v2304_v8 = vld [vmem:[#allocation5 + $0xa4] ss:$16 sps:$4 sm:$0xff]   ;;  %v2308_v10 = vld [vmem:[#allocation5 + $0xa0] ss:$16 sps:$4 sm:$0xff]   ;;  %p2706_p6 = scmp.ne.s32.totalorder %s1990_s16, %s2705_s17  ;;  %p2711_p8 = scmp.lt.s32.totalorder %s2705_s17, %s2705_s17 }
  0x39   :  { %v2306_v9 = vld [vmem:[#allocation5 + $0x2a4] ss:$16 sps:$4 sm:$0xff]   ;;  %v2309_v11 = vld [vmem:[#allocation5 + $0x2a0] ss:$16 sps:$4 sm:$0xff]  }
  0x3a   :  { %1306 = vmatpush1.bf16.msra.mxu0 %v2302_v6  ;;  %v2310_v12 = vld [vmem:[#allocation5 + $0x84] ss:$16 sps:$4 sm:$0xff]   ;;  %v2314_v14 = vld [vmem:[#allocation5 + $0x80] ss:$16 sps:$4 sm:$0xff]   ;;  %p2712_p9 = por %p2711_p8, %p2710_p7 }
  0x3b   :  { %1347 = vmatpush1.bf16.msra.mxu1 %v2303_v7  ;;  %1307 = vmatprep.subr.bf16.mxu0 %v2304_v8  ;;  %v2312_v13 = vld [vmem:[#allocation5 + $0x284] ss:$16 sps:$4 sm:$0xff]   ;;  %v2315_v15 = vld [vmem:[#allocation5 + $0x280] ss:$16 sps:$4 sm:$0xff]  }
  0x3c   :  { %1348 = vmatprep.subr.bf16.mxu1 %v2306_v9  ;;  %v2316_v16 = vld [vmem:[#allocation5 + $0x64] ss:$16 sps:$4 sm:$0xff]   ;;  %v2320_v18 = vld [vmem:[#allocation5 + $0x60] ss:$16 sps:$4 sm:$0xff]   ;;  %p2713_p10 = pnand %p2712_p9, %p2706_p6 }
  0x3d   :  { %v2318_v17 = vld [vmem:[#allocation5 + $0x264] ss:$16 sps:$4 sm:$0xff]   ;;  %v2321_v19 = vld [vmem:[#allocation5 + $0x260] ss:$16 sps:$4 sm:$0xff]  }
  0x3e   :  { %1308 = vmatpush1.bf16.msra.mxu0 %v2308_v10  ;;  %v2322_v20 = vld [vmem:[#allocation5 + $0x44] ss:$16 sps:$4 sm:$0xff]   ;;  %v2326_v22 = vld [vmem:[#allocation5 + $0x40] ss:$16 sps:$4 sm:$0xff]  }
  0x3f   :  { %1349 = vmatpush1.bf16.msra.mxu1 %v2309_v11  ;;  %1309 = vmatprep.subr.bf16.mxu0 %v2310_v12  ;;  %v2324_v21 = vld [vmem:[#allocation5 + $0x244] ss:$16 sps:$4 sm:$0xff]   ;;  %v2327_v23 = vld [vmem:[#allocation5 + $0x240] ss:$16 sps:$4 sm:$0xff]   ;;  %v2403_v11 = vld [vmem:[#allocation5 + $0xec] ss:$16 sps:$4 sm:$0xff]  }
  0x40   :  { %1350 = vmatprep.subr.bf16.mxu1 %v2312_v13  ;;  %v2328_v24 = vld [vmem:[#allocation5 + $0x24] ss:$16 sps:$4 sm:$0xff]   ;;  %v2332_v26 = vld [vmem:[#allocation5 + $0x20] ss:$16 sps:$4 sm:$0xff]   ;;  %v2741_v13 = vmov 0  }
  0x41   :  { %v2330_v25 = vld [vmem:[#allocation5 + $0x224] ss:$16 sps:$4 sm:$0xff]   ;;  %v2333_v27 = vld [vmem:[#allocation5 + $0x220] ss:$16 sps:$4 sm:$0xff]  }
  0x42   :  { %1310 = vmatpush1.bf16.msra.mxu0 %v2314_v14  ;;  %v2334_v28 = vld [vmem:[#allocation5 + $0x4] ss:$16 sps:$4 sm:$0xff]   ;;  %v2338_v30 = vld [vmem:[#allocation5] ss:$16 sps:$4 sm:$0xff]  }
  0x43   :  { %1351 = vmatpush1.bf16.msra.mxu1 %v2315_v15  ;;  %1311 = vmatprep.subr.bf16.mxu0 %v2316_v16  ;;  %v2336_v29 = vld [vmem:[#allocation5 + $0x204] ss:$16 sps:$4 sm:$0xff]   ;;  %v2339_v31 = vld [vmem:[#allocation5 + $0x200] ss:$16 sps:$4 sm:$0xff]   ;;  %v2401_v15 = vld [vmem:[#allocation5 + $0xe8] ss:$16 sps:$4 sm:$0xff]  }
  0x44   :  { %1352 = vmatprep.subr.bf16.mxu1 %v2318_v17  ;;  %v2340_v32 = vld [vmem:[#allocation5 + $0x1e4] ss:$16 sps:$4 sm:$0xff]   ;;  %v2344_v34 = vld [vmem:[#allocation5 + $0x1e0] ss:$16 sps:$4 sm:$0xff]   ;;  %v2798_v17 = vld [vmem:[#allocation2 + $0x18] ss:$0 sps:$4 sm:$0xff]  }
  0x45   :  { %v2342_v33 = vld [vmem:[#allocation5 + $0x3e4] ss:$16 sps:$4 sm:$0xff]   ;;  %v2345_v35 = vld [vmem:[#allocation5 + $0x3e0] ss:$16 sps:$4 sm:$0xff]  }
  0x46   :  { %1312 = vmatpush1.bf16.msra.mxu0 %v2320_v18  ;;  %v2346_v36 = vld [vmem:[#allocation5 + $0x1c4] ss:$16 sps:$4 sm:$0xff]   ;;  %v2350_v38 = vld [vmem:[#allocation5 + $0x1c0] ss:$16 sps:$4 sm:$0xff]   ;;  %v2410_v18 = vld [vmem:[#allocation5 + $0xcc] ss:$16 sps:$4 sm:$0xff]  }
  0x47   :  { %1353 = vmatpush1.bf16.msra.mxu1 %v2321_v19  ;;  %1313 = vmatprep.subr.bf16.mxu0 %v2322_v20  ;;  %v2348_v37 = vld [vmem:[#allocation5 + $0x3c4] ss:$16 sps:$4 sm:$0xff]   ;;  %v2351_v39 = vld [vmem:[#allocation5 + $0x3c0] ss:$16 sps:$4 sm:$0xff]   ;;  %v2408_v20 = vld [vmem:[#allocation5 + $0xc8] ss:$16 sps:$4 sm:$0xff]  }
  0x48   :  { %1354 = vmatprep.subr.bf16.mxu1 %v2324_v21  ;;  %v2352_v40 = vld [vmem:[#allocation5 + $0x1a4] ss:$16 sps:$4 sm:$0xff]   ;;  %v2356_v42 = vld [vmem:[#allocation5 + $0x1a0] ss:$16 sps:$4 sm:$0xff]  }
  0x49   :  { %v2354_v41 = vld [vmem:[#allocation5 + $0x3a4] ss:$16 sps:$4 sm:$0xff]   ;;  %v2357_v43 = vld [vmem:[#allocation5 + $0x3a0] ss:$16 sps:$4 sm:$0xff]  }
  0x4a   :  { %1314 = vmatpush1.bf16.msra.mxu0 %v2326_v22  ;;  %v2358_v44 = vld [vmem:[#allocation5 + $0x184] ss:$16 sps:$4 sm:$0xff]   ;;  %v74_v48 = vld [vmem:[#allocation2 + $0x8] sm:$0xff] }
  0x4b   :  { %1355 = vmatpush1.bf16.msra.mxu1 %v2327_v23  ;;  %1315 = vmatprep.subr.bf16.mxu0 %v2328_v24  ;;  %v2360_v45 = vld [vmem:[#allocation5 + $0x384] ss:$16 sps:$4 sm:$0xff]   ;;  %v2362_v49 = vld [vmem:[#allocation5 + $0x180] ss:$16 sps:$4 sm:$0xff]   ;;  %v2787_v51 = vcombine.high %v74_v48, %v74_v48  ;;  %v2793_v7 = vcombine.low %v74_v48, %v74_v48  ;;  %v2416_v22 = vld [vmem:[#allocation5 + $0xac] ss:$16 sps:$4 sm:$0xff]  }
  0x4c   :  { %1356 = vmatprep.subr.bf16.mxu1 %v2330_v25  ;;  %v73_v46 = vld [vmem:[#allocation2] sm:$0xff]  ;;  %v2363_v50 = vld [vmem:[#allocation5 + $0x380] ss:$16 sps:$4 sm:$0xff]   ;;  %v2452_v48 = vld [vmem:[#allocation5 + $0x1ec] ss:$16 sps:$4 sm:$0xff]  }
  0x4d   :  { %v2785_v47 = vcombine.high %v73_v46, %v73_v46  ;;  %v2364_v52 = vld [vmem:[#allocation5 + $0x164] ss:$16 sps:$4 sm:$0xff]   ;;  %1376 = vmatprep.mubr.bf16.mxu1 %v2787_v51  ;;  %v2368_v54 = vld [vmem:[#allocation5 + $0x160] ss:$16 sps:$4 sm:$0xff]   ;;  %v2791_v6 = vcombine.low %v73_v46, %v73_v46  ;;  %v2414_v24 = vld [vmem:[#allocation5 + $0xa8] ss:$16 sps:$4 sm:$0xff]  }
  0x4e   :  { %1316 = vmatpush1.bf16.msra.mxu0 %v2332_v26  ;;  %v2366_v53 = vld [vmem:[#allocation5 + $0x364] ss:$16 sps:$4 sm:$0xff]   ;;  %v2369_v55 = vld [vmem:[#allocation5 + $0x360] ss:$16 sps:$4 sm:$0xff]   ;;  %v2422_v26 = vld [vmem:[#allocation5 + $0x8c] ss:$16 sps:$4 sm:$0xff]  }
  0x4f   :  { %1357 = vmatpush1.bf16.msra.mxu1 %v2333_v27  ;;  %1317 = vmatprep.subr.bf16.mxu0 %v2334_v28  ;;  %v2370_v56 = vld [vmem:[#allocation5 + $0x144] ss:$16 sps:$4 sm:$0xff]   ;;  %v2374_v58 = vld [vmem:[#allocation5 + $0x140] ss:$16 sps:$4 sm:$0xff]   ;;  %v2420_v28 = vld [vmem:[#allocation5 + $0x88] ss:$16 sps:$4 sm:$0xff]  }
  0x50   :  { %1358 = vmatprep.subr.bf16.mxu1 %v2336_v29  ;;  %1335 = vmatprep.mubr.bf16.mxu0 %v2785_v47  ;;  %v2372_v57 = vld [vmem:[#allocation5 + $0x344] ss:$16 sps:$4 sm:$0xff]   ;;  %v2375_v59 = vld [vmem:[#allocation5 + $0x340] ss:$16 sps:$4 sm:$0xff]   ;;  %v2444_v46 = vld [vmem:[#allocation5 + $0x8] ss:$16 sps:$4 sm:$0xff]  }
  0x51   :  { %v2376_v60 = vld [vmem:[#allocation5 + $0x124] ss:$16 sps:$4 sm:$0xff]   ;;  %v2380_v62 = vld [vmem:[#allocation5 + $0x120] ss:$16 sps:$4 sm:$0xff]  }
  0x52   :  { %1318 = vmatpush1.bf16.msra.mxu0 %v2338_v30  ;;  %v2378_v61 = vld [vmem:[#allocation5 + $0x324] ss:$16 sps:$4 sm:$0xff]   ;;  %v2381_v63 = vld [vmem:[#allocation5 + $0x320] ss:$16 sps:$4 sm:$0xff]   ;;  %v2428_v30 = vld [vmem:[#allocation5 + $0x6c] ss:$16 sps:$4 sm:$0xff]  }
  0x53   :  { %1359 = vmatpush1.bf16.msra.mxu1 %v2339_v31  ;;  %1319 = vmatprep.subr.bf16.mxu0 %v2340_v32  ;;  %v2382_v0 = vld [vmem:[#allocation5 + $0x104] ss:$16 sps:$4 sm:$0xff]   ;;  %v2386_v2 = vld [vmem:[#allocation5 + $0x100] ss:$16 sps:$4 sm:$0xff]  }
  0x54   :  { %1360 = vmatprep.subr.bf16.mxu1 %v2342_v33  ;;  %v2384_v1 = vld [vmem:[#allocation5 + $0x304] ss:$16 sps:$4 sm:$0xff]   ;;  %v2387_v3 = vld [vmem:[#allocation5 + $0x300] ss:$16 sps:$4 sm:$0xff]  }
  0x55   :  { %v2394_v4 = vld [vmem:[#allocation5 + $0x4e4] ss:$16 sps:$4 sm:$0xff]   ;;  %v2392_v8 = vld [vmem:[#allocation5 + $0x4e0] ss:$16 sps:$4 sm:$0xff]  }
  0x56   :  { %1320 = vmatpush2.bf16.msra.mxu0 %v2344_v34  ;;  %v2397_v5 = vld [vmem:[#allocation5 + $0x604] ss:$16 sps:$4 sm:$0xff]   ;;  %v2395_v9 = vld [vmem:[#allocation5 + $0x600] ss:$16 sps:$4 sm:$0xff]   ;;  %v2426_v34 = vld [vmem:[#allocation5 + $0x68] ss:$16 sps:$4 sm:$0xff]  }
  0x57   :  { %1361 = vmatpush2.bf16.msra.mxu1 %v2345_v35  ;;  %1321 = vmatprep.subr.bf16.mxu0 %v2346_v36  ;;  %v2400_v10 = vld [vmem:[#allocation5 + $0x4c4] ss:$16 sps:$4 sm:$0xff]   ;;  %v2398_v12 = vld [vmem:[#allocation5 + $0x4c0] ss:$16 sps:$4 sm:$0xff]   ;;  %v2434_v36 = vld [vmem:[#allocation5 + $0x4c] ss:$16 sps:$4 sm:$0xff]  }
  0x58   :  { %1362 = vmatprep.subr.bf16.mxu1 %v2348_v37  ;;  %v2406_v14 = vld [vmem:[#allocation5 + $0x4a4] ss:$16 sps:$4 sm:$0xff]   ;;  %v2404_v16 = vld [vmem:[#allocation5 + $0x4a0] ss:$16 sps:$4 sm:$0xff]  }
  0x59   :  { %v2413_v19 = vld [vmem:[#allocation5 + $0x484] ss:$16 sps:$4 sm:$0xff]   ;;  %v2411_v21 = vld [vmem:[#allocation5 + $0x480] ss:$16 sps:$4 sm:$0xff]  }
  0x5a   :  { %1322 = vmatpush2.bf16.msra.mxu0 %v2350_v38  ;;  %v2419_v23 = vld [vmem:[#allocation5 + $0x464] ss:$16 sps:$4 sm:$0xff]   ;;  %v2417_v25 = vld [vmem:[#allocation5 + $0x460] ss:$16 sps:$4 sm:$0xff]   ;;  %v2432_v38 = vld [vmem:[#allocation5 + $0x48] ss:$16 sps:$4 sm:$0xff]  }
  0x5b   :  { %1363 = vmatpush2.bf16.msra.mxu1 %v2351_v39  ;;  %1323 = vmatprep.subr.bf16.mxu0 %v2352_v40  ;;  %v2425_v27 = vld [vmem:[#allocation5 + $0x444] ss:$16 sps:$4 sm:$0xff]   ;;  %v2423_v29 = vld [vmem:[#allocation5 + $0x440] ss:$16 sps:$4 sm:$0xff]   ;;  %v2440_v40 = vld [vmem:[#allocation5 + $0x2c] ss:$16 sps:$4 sm:$0xff]  }
  0x5c   :  { %1364 = vmatprep.subr.bf16.mxu1 %v2354_v41  ;;  %v2431_v31 = vld [vmem:[#allocation5 + $0x424] ss:$16 sps:$4 sm:$0xff]   ;;  %v2429_v35 = vld [vmem:[#allocation5 + $0x420] ss:$16 sps:$4 sm:$0xff]  }
  0x5d   :  { %v2803_v32 = vld [vmem:[#allocation2 + $0x10] sm:$0xff]  ;;  %v2435_v39 = vld [vmem:[#allocation5 + $0x400] ss:$16 sps:$4 sm:$0xff]  }
  0x5e   :  { %1324 = vmatpush2.bf16.msra.mxu0 %v2356_v42  ;;  %v2807_v33 = vcombine.high %v2803_v32, %v2803_v32  ;;  %v2437_v37 = vld [vmem:[#allocation5 + $0x404] ss:$16 sps:$4 sm:$0xff]   ;;  %v2438_v42 = vld [vmem:[#allocation5 + $0x28] ss:$16 sps:$4 sm:$0xff]  }
  0x5f   :  { %1365 = vmatpush2.bf16.msra.mxu1 %v2357_v43  ;;  %1325 = vmatprep.subr.bf16.mxu0 %v2358_v44  ;;  %v2443_v41 = vld [vmem:[#allocation5 + $0x5e4] ss:$16 sps:$4 sm:$0xff]   ;;  %v2441_v43 = vld [vmem:[#allocation5 + $0x5e0] ss:$16 sps:$4 sm:$0xff]   ;;  %v2446_v44 = vld [vmem:[#allocation5 + $0xc] ss:$16 sps:$4 sm:$0xff]  }
  0x60   :  { %1366 = vmatprep.subr.bf16.mxu1 %v2360_v45  ;;  %v2449_v45 = vld [vmem:[#allocation5 + $0x5c4] ss:$16 sps:$4 sm:$0xff]  }
  0x62   :  { %1326 = vmatpush2.bf16.msra.mxu0 %v2362_v49  ;;  %v2455_v49 = vld [vmem:[#allocation5 + $0x5a4] ss:$16 sps:$4 sm:$0xff]  }
  0x63   :  { %1367 = vmatpush2.bf16.msra.mxu1 %v2363_v50  ;;  %1327 = vmatprep.subr.bf16.mxu0 %v2364_v52  ;;  %v2450_v50 = vld [vmem:[#allocation5 + $0x1e8] ss:$16 sps:$4 sm:$0xff]   ;;  %v2453_v52 = vld [vmem:[#allocation5 + $0x5a0] ss:$16 sps:$4 sm:$0xff]  }
  0x64   :  { %1368 = vmatprep.subr.bf16.mxu1 %v2366_v53  ;;  %v2458_v53 = vld [vmem:[#allocation5 + $0x1cc] ss:$16 sps:$4 sm:$0xff]  }
  0x66   :  { %1328 = vmatpush2.bf16.msra.mxu0 %v2368_v54  ;;  %v2461_v54 = vld [vmem:[#allocation5 + $0x584] ss:$16 sps:$4 sm:$0xff]  }
  0x67   :  { %1369 = vmatpush2.bf16.msra.mxu1 %v2369_v55  ;;  %1329 = vmatprep.subr.bf16.mxu0 %v2370_v56  ;;  %v2456_v55 = vld [vmem:[#allocation5 + $0x1c8] ss:$16 sps:$4 sm:$0xff]   ;;  %v2459_v56 = vld [vmem:[#allocation5 + $0x580] ss:$16 sps:$4 sm:$0xff]  }
  0x68   :  { %1370 = vmatprep.subr.bf16.mxu1 %v2372_v57  ;;  %v2464_v57 = vld [vmem:[#allocation5 + $0x1ac] ss:$16 sps:$4 sm:$0xff]  }
  0x6a   :  { %1330 = vmatpush2.bf16.msra.mxu0 %v2374_v58  ;;  %v2467_v58 = vld [vmem:[#allocation5 + $0x564] ss:$16 sps:$4 sm:$0xff]  }
  0x6b   :  { %1371 = vmatpush2.bf16.msra.mxu1 %v2375_v59  ;;  %1331 = vmatprep.subr.bf16.mxu0 %v2376_v60  ;;  %v2462_v59 = vld [vmem:[#allocation5 + $0x1a8] ss:$16 sps:$4 sm:$0xff]   ;;  %v2465_v60 = vld [vmem:[#allocation5 + $0x560] ss:$16 sps:$4 sm:$0xff]  }
  0x6c   :  { %1372 = vmatprep.subr.bf16.mxu1 %v2378_v61  ;;  %v2470_v61 = vld [vmem:[#allocation5 + $0x18c] ss:$16 sps:$4 sm:$0xff]  }
  0x6e   :  { %1332 = vmatpush2.bf16.msra.mxu0 %v2380_v62  ;;  %v2473_v62 = vld [vmem:[#allocation5 + $0x544] ss:$16 sps:$4 sm:$0xff]  }
  0x6f   :  { %1373 = vmatpush2.bf16.msra.mxu1 %v2381_v63  ;;  %1333 = vmatprep.subr.bf16.mxu0 %v2382_v0  ;;  %v2468_v63 = vld [vmem:[#allocation5 + $0x188] ss:$16 sps:$4 sm:$0xff]   ;;  %v2471_v0 = vld [vmem:[#allocation5 + $0x540] ss:$16 sps:$4 sm:$0xff]  }
  0x70   :  { %1374 = vmatprep.subr.bf16.mxu1 %v2384_v1  ;;  %v2476_v1 = vld [vmem:[#allocation5 + $0x16c] ss:$16 sps:$4 sm:$0xff]  }
  0x72   :  { %1334 = vmatpush2.bf16.msra.mxu0 %v2386_v2  ;;  %v2479_v2 = vld [vmem:[#allocation5 + $0x524] ss:$16 sps:$4 sm:$0xff]  }
  0x73   :  { %1375 = vmatpush2.bf16.msra.mxu1 %v2387_v3  ;;  %1385 = vmatprep.subr.bf16.mxu0 %v2394_v4  ;;  %v2474_v3 = vld [vmem:[#allocation5 + $0x168] ss:$16 sps:$4 sm:$0xff]   ;;  %v2477_v4 = vld [vmem:[#allocation5 + $0x520] ss:$16 sps:$4 sm:$0xff]  }
  0x74   :  { %1440 = vmatprep.subr.bf16.mxu1 %v2397_v5  ;;  %v2482_v5 = vld [vmem:[#allocation5 + $0x14c] ss:$16 sps:$4 sm:$0xff]  }
  0x75   :  { %1336 = vmatmul.mubr.bf16.vlgmr.msra.gmra.mxu0 %v2791_v6 }
  0x76   :  { %1377 = vmatmul.mubr.bf16.vlgmr.msra.gmra.mxu1 %v2793_v7  ;;  %1386 = vmatpush1.bf16.msra.mxu0 %v2392_v8  ;;  %v2485_v8 = vld [vmem:[#allocation5 + $0x504] ss:$16 sps:$4 sm:$0xff]  }
  0x77   :  { %1441 = vmatpush1.bf16.msra.mxu1 %v2395_v9  ;;  %1387 = vmatprep.subr.bf16.mxu0 %v2400_v10  ;;  %v2480_v9 = vld [vmem:[#allocation5 + $0x148] ss:$16 sps:$4 sm:$0xff]   ;;  %v2483_v10 = vld [vmem:[#allocation5 + $0x500] ss:$16 sps:$4 sm:$0xff]  }
  0x78   :  { %1458 = vmatprep.mubr.bf16.mxu1 %v2741_v13  ;;  %1467 = vmatprep.subr.bf16.mxu1 %v2403_v11  ;;  %v2490_v11 = vld [vmem:[#allocation5 + $0x12c] ss:$16 sps:$4 sm:$0xff]  }
  0x79   :  { %1417 = vmatprep.mubr.bf16.mxu0 %v2807_v33 }
  0x7a   :  { %1388 = vmatpush1.bf16.msra.mxu0 %v2398_v12  ;;  %v2493_v12 = vld [vmem:[#allocation5 + $0x2ec] ss:$16 sps:$4 sm:$0xff]  }
  0x7b   :  { %1389 = vmatprep.subr.bf16.mxu0 %v2406_v14  ;;  %v2812_v14 = vcombine.low %v2803_v32, %v2803_v32  ;;  %v2512_v32 = vld [vmem:[#allocation5 + $0x4a8] ss:$16 sps:$4 sm:$0xff]  }
  0x7e   :  { %2203 = vmatmul.mubr.msk.bf16.vlgmr.msra.gmra.mxu1 %vm1299_vm0, %v2798_v17  ;;  %1390 = vmatpush1.bf16.msra.mxu0 %v2404_v16  ;;  %v2491_v16 = vld [vmem:[#allocation5 + $0x2e8] ss:$16 sps:$4 sm:$0xff]  }
  0x7f   :  { %1468 = vmatpush1.bf16.msra.mxu1 %v2401_v15  ;;  %1391 = vmatprep.subr.bf16.mxu0 %v2413_v19  ;;  %v2488_v15 = vld [vmem:[#allocation5 + $0x128] ss:$16 sps:$4 sm:$0xff]   ;;  %v2499_v19 = vld [vmem:[#allocation5 + $0x2cc] ss:$16 sps:$4 sm:$0xff]  }
  0x80   :  { %1469 = vmatprep.subr.bf16.mxu1 %v2410_v18  ;;  %1499 = vmatprep.mubr.bf16.mxu1 %v2785_v47  ;;  %v2447_v47 = vld [vmem:[#allocation5 + $0x5c0] ss:$16 sps:$4 sm:$0xff]   ;;  %v2496_v18 = vld [vmem:[#allocation5 + $0x10c] ss:$16 sps:$4 sm:$0xff]  }
  0x82   :  { %1392 = vmatpush1.bf16.msra.mxu0 %v2411_v21  ;;  %v2497_v21 = vld [vmem:[#allocation5 + $0x2c8] ss:$16 sps:$4 sm:$0xff]  }
  0x83   :  { %1470 = vmatpush1.bf16.msra.mxu1 %v2408_v20  ;;  %1393 = vmatprep.subr.bf16.mxu0 %v2419_v23  ;;  %v2494_v20 = vld [vmem:[#allocation5 + $0x108] ss:$16 sps:$4 sm:$0xff]   ;;  %v2505_v23 = vld [vmem:[#allocation5 + $0x2ac] ss:$16 sps:$4 sm:$0xff]  }
  0x84   :  { %1471 = vmatprep.subr.bf16.mxu1 %v2416_v22  ;;  %v2502_v22 = vld [vmem:[#allocation5 + $0x4ec] ss:$16 sps:$4 sm:$0xff]  }
  0x86   :  { %1394 = vmatpush1.bf16.msra.mxu0 %v2417_v25  ;;  %v2503_v25 = vld [vmem:[#allocation5 + $0x2a8] ss:$16 sps:$4 sm:$0xff]  }
  0x87   :  { %1472 = vmatpush1.bf16.msra.mxu1 %v2414_v24  ;;  %1395 = vmatprep.subr.bf16.mxu0 %v2425_v27  ;;  %v2500_v24 = vld [vmem:[#allocation5 + $0x4e8] ss:$16 sps:$4 sm:$0xff]   ;;  %v2511_v27 = vld [vmem:[#allocation5 + $0x28c] ss:$16 sps:$4 sm:$0xff]  }
  0x88   :  { %1473 = vmatprep.subr.bf16.mxu1 %v2422_v26  ;;  %v2508_v26 = vld [vmem:[#allocation5 + $0x4cc] ss:$16 sps:$4 sm:$0xff]  }
  0x8a   :  { %1396 = vmatpush1.bf16.msra.mxu0 %v2423_v29  ;;  %v2509_v29 = vld [vmem:[#allocation5 + $0x288] ss:$16 sps:$4 sm:$0xff]  }
  0x8b   :  { %1474 = vmatpush1.bf16.msra.mxu1 %v2420_v28  ;;  %1397 = vmatprep.subr.bf16.mxu0 %v2431_v31  ;;  %v2506_v28 = vld [vmem:[#allocation5 + $0x4c8] ss:$16 sps:$4 sm:$0xff]   ;;  %v2517_v31 = vld [vmem:[#allocation5 + $0x26c] ss:$16 sps:$4 sm:$0xff]  }
  0x8c   :  { %1475 = vmatprep.subr.bf16.mxu1 %v2428_v30  ;;  %v2514_v30 = vld [vmem:[#allocation5 + $0x4ac] ss:$16 sps:$4 sm:$0xff]  }
  0x8e   :  { %1398 = vmatpush1.bf16.msra.mxu0 %v2429_v35  ;;  %v2523_v35 = vld [vmem:[#allocation5 + $0x24c] ss:$16 sps:$4 sm:$0xff]  }
  0x8f   :  { %1476 = vmatpush1.bf16.msra.mxu1 %v2426_v34  ;;  %1399 = vmatprep.subr.bf16.mxu0 %v2437_v37  ;;  %v2515_v34 = vld [vmem:[#allocation5 + $0x268] ss:$16 sps:$4 sm:$0xff]  }
  0x90   :  { %1477 = vmatprep.subr.bf16.mxu1 %v2434_v36  ;;  %v2518_v36 = vld [vmem:[#allocation5 + $0x488] ss:$16 sps:$4 sm:$0xff]  }
  0x91   :  { %v2521_v37 = vld [vmem:[#allocation5 + $0x248] ss:$16 sps:$4 sm:$0xff]  }
  0x92   :  { %1400 = vmatpush1.bf16.msra.mxu0 %v2435_v39  ;;  %v2524_v39 = vld [vmem:[#allocation5 + $0x468] ss:$16 sps:$4 sm:$0xff]  }
  0x93   :  { %1478 = vmatpush1.bf16.msra.mxu1 %v2432_v38  ;;  %1401 = vmatprep.subr.bf16.mxu0 %v2443_v41  ;;  %v2526_v38 = vld [vmem:[#allocation5 + $0x46c] ss:$16 sps:$4 sm:$0xff]  }
  0x94   :  { %1479 = vmatprep.subr.bf16.mxu1 %v2440_v40  ;;  %v2527_v40 = vld [vmem:[#allocation5 + $0x228] ss:$16 sps:$4 sm:$0xff]   ;;  %v2532_v41 = vld [vmem:[#allocation5 + $0x44c] ss:$16 sps:$4 sm:$0xff]  }
  0x96   :  { %1402 = vmatpush2.bf16.msra.mxu0 %v2441_v43  ;;  %v2533_v43 = vld [vmem:[#allocation5 + $0x208] ss:$16 sps:$4 sm:$0xff]  }
  0x97   :  { %1480 = vmatpush1.bf16.msra.mxu1 %v2438_v42  ;;  %1403 = vmatprep.subr.bf16.mxu0 %v2449_v45  ;;  %v2535_v42 = vld [vmem:[#allocation5 + $0x20c] ss:$16 sps:$4 sm:$0xff]  }
  0x98   :  { %1481 = vmatprep.subr.bf16.mxu1 %v2446_v44  ;;  %v2538_v44 = vld [vmem:[#allocation5 + $0x42c] ss:$16 sps:$4 sm:$0xff]  }
  0x99   :  { %v2541_v45 = vld [vmem:[#allocation5 + $0x3ec] ss:$16 sps:$4 sm:$0xff]  }
  0x9a   :  { %1404 = vmatpush2.bf16.msra.mxu0 %v2447_v47  ;;  %v2539_v47 = vld [vmem:[#allocation5 + $0x3e8] ss:$16 sps:$4 sm:$0xff]  }
  0x9b   :  { %1482 = vmatpush1.bf16.msra.mxu1 %v2444_v46  ;;  %1405 = vmatprep.subr.bf16.mxu0 %v2455_v49  ;;  %v2536_v46 = vld [vmem:[#allocation5 + $0x428] ss:$16 sps:$4 sm:$0xff]   ;;  %v2547_v49 = vld [vmem:[#allocation5 + $0x3cc] ss:$16 sps:$4 sm:$0xff]  }
  0x9c   :  { %1483 = vmatprep.subr.bf16.mxu1 %v2452_v48  ;;  %v2544_v48 = vld [vmem:[#allocation5 + $0x40c] ss:$16 sps:$4 sm:$0xff]  }
  0x9e   :  { %1406 = vmatpush2.bf16.msra.mxu0 %v2453_v52  ;;  %v2545_v52 = vld [vmem:[#allocation5 + $0x3c8] ss:$16 sps:$4 sm:$0xff]  }
  0x9f   :  { %1484 = vmatpush2.bf16.msra.mxu1 %v2450_v50  ;;  %1407 = vmatprep.subr.bf16.mxu0 %v2461_v54  ;;  %v2542_v50 = vld [vmem:[#allocation5 + $0x408] ss:$16 sps:$4 sm:$0xff]   ;;  %v2553_v54 = vld [vmem:[#allocation5 + $0x3ac] ss:$16 sps:$4 sm:$0xff]  }
  0xa0   :  { %1485 = vmatprep.subr.bf16.mxu1 %v2458_v53  ;;  %v2550_v53 = vld [vmem:[#allocation5 + $0x5ec] ss:$16 sps:$4 sm:$0xff]  }
  0xa2   :  { %1408 = vmatpush2.bf16.msra.mxu0 %v2459_v56  ;;  %v2551_v56 = vld [vmem:[#allocation5 + $0x3a8] ss:$16 sps:$4 sm:$0xff]  }
  0xa3   :  { %1486 = vmatpush2.bf16.msra.mxu1 %v2456_v55  ;;  %1409 = vmatprep.subr.bf16.mxu0 %v2467_v58  ;;  %v2548_v55 = vld [vmem:[#allocation5 + $0x5e8] ss:$16 sps:$4 sm:$0xff]   ;;  %v2559_v58 = vld [vmem:[#allocation5 + $0x38c] ss:$16 sps:$4 sm:$0xff]  }
  0xa4   :  { %1487 = vmatprep.subr.bf16.mxu1 %v2464_v57  ;;  %v2556_v57 = vld [vmem:[#allocation5 + $0x5cc] ss:$16 sps:$4 sm:$0xff]  }
  0xa6   :  { %1410 = vmatpush2.bf16.msra.mxu0 %v2465_v60  ;;  %v2557_v60 = vld [vmem:[#allocation5 + $0x388] ss:$16 sps:$4 sm:$0xff]  }
  0xa7   :  { %1488 = vmatpush2.bf16.msra.mxu1 %v2462_v59  ;;  %1411 = vmatprep.subr.bf16.mxu0 %v2473_v62  ;;  %v2554_v59 = vld [vmem:[#allocation5 + $0x5c8] ss:$16 sps:$4 sm:$0xff]   ;;  %v2565_v62 = vld [vmem:[#allocation5 + $0x36c] ss:$16 sps:$4 sm:$0xff]  }
  0xa8   :  { %1489 = vmatprep.subr.bf16.mxu1 %v2470_v61  ;;  %v2562_v61 = vld [vmem:[#allocation5 + $0x5ac] ss:$16 sps:$4 sm:$0xff]  }
  0xaa   :  { %1412 = vmatpush2.bf16.msra.mxu0 %v2471_v0  ;;  %v2563_v0 = vld [vmem:[#allocation5 + $0x368] ss:$16 sps:$4 sm:$0xff]  }
  0xab   :  { %1490 = vmatpush2.bf16.msra.mxu1 %v2468_v63  ;;  %1413 = vmatprep.subr.bf16.mxu0 %v2479_v2  ;;  %v2560_v63 = vld [vmem:[#allocation5 + $0x5a8] ss:$16 sps:$4 sm:$0xff]   ;;  %v2571_v2 = vld [vmem:[#allocation5 + $0x34c] ss:$16 sps:$4 sm:$0xff]  }
  0xac   :  { %1491 = vmatprep.subr.bf16.mxu1 %v2476_v1  ;;  %v2568_v1 = vld [vmem:[#allocation5 + $0x58c] ss:$16 sps:$4 sm:$0xff]  }
  0xae   :  { %1414 = vmatpush2.bf16.msra.mxu0 %v2477_v4  ;;  %v2569_v4 = vld [vmem:[#allocation5 + $0x348] ss:$16 sps:$4 sm:$0xff]  }
  0xaf   :  { %1492 = vmatpush2.bf16.msra.mxu1 %v2474_v3  ;;  %1415 = vmatprep.subr.bf16.mxu0 %v2485_v8  ;;  %v2566_v3 = vld [vmem:[#allocation5 + $0x588] ss:$16 sps:$4 sm:$0xff]   ;;  %v2577_v8 = vld [vmem:[#allocation5 + $0x32c] ss:$16 sps:$4 sm:$0xff]  }
  0xb0   :  { %1493 = vmatprep.subr.bf16.mxu1 %v2482_v5  ;;  %v2574_v5 = vld [vmem:[#allocation5 + $0x56c] ss:$16 sps:$4 sm:$0xff]  }
  0xb2   :  { %1416 = vmatpush2.bf16.msra.mxu0 %v2483_v10  ;;  %v2575_v10 = vld [vmem:[#allocation5 + $0x328] ss:$16 sps:$4 sm:$0xff]  }
  0xb3   :  { %1494 = vmatpush2.bf16.msra.mxu1 %v2480_v9  ;;  %1508 = vmatprep.subr.bf16.mxu0 %v2493_v12  ;;  %v2572_v9 = vld [vmem:[#allocation5 + $0x568] ss:$16 sps:$4 sm:$0xff]   ;;  %v2583_v12 = vld [vmem:[#allocation5 + $0x30c] ss:$16 sps:$4 sm:$0xff]  }
  0xb4   :  { %1495 = vmatprep.subr.bf16.mxu1 %v2490_v11  ;;  %v2580_v11 = vld [vmem:[#allocation5 + $0x54c] ss:$16 sps:$4 sm:$0xff]  }
  0xb5   :  { %1418 = vmatmul.mubr.bf16.vlgmr.msra.gmra.mxu0 %v2812_v14 }
  0xb6   :  { %1509 = vmatpush1.bf16.msra.mxu0 %v2491_v16  ;;  %1540 = vmatprep.mubr.bf16.mxu0 %v2787_v51  ;;  %v2520_v51 = vld [vmem:[#allocation5 + $0x48c] ss:$16 sps:$4 sm:$0xff]   ;;  %v2581_v16 = vld [vmem:[#allocation5 + $0x308] ss:$16 sps:$4 sm:$0xff]  }
  0xb7   :  { %1496 = vmatpush2.bf16.msra.mxu1 %v2488_v15  ;;  %1510 = vmatprep.subr.bf16.mxu0 %v2499_v19  ;;  %v2578_v15 = vld [vmem:[#allocation5 + $0x548] ss:$16 sps:$4 sm:$0xff]   ;;  %v2589_v19 = vld [vmem:[#allocation5 + $0x60c] ss:$16 sps:$4 sm:$0xff]  }
  0xb8   :  { %1497 = vmatprep.subr.bf16.mxu1 %v2496_v18  ;;  %v2586_v18 = vld [vmem:[#allocation5 + $0x52c] ss:$16 sps:$4 sm:$0xff]  }
  0xba   :  { %1511 = vmatpush1.bf16.msra.mxu0 %v2497_v21  ;;  %v2587_v21 = vld [vmem:[#allocation5 + $0x608] ss:$16 sps:$4 sm:$0xff]  }
  0xbb   :  { %1498 = vmatpush2.bf16.msra.mxu1 %v2494_v20  ;;  %1512 = vmatprep.subr.bf16.mxu0 %v2505_v23  ;;  %v2584_v20 = vld [vmem:[#allocation5 + $0x528] ss:$16 sps:$4 sm:$0xff]   ;;  %v2593_v23 = vld [vmem:[#allocation8 + $0x78] sm:$0xff]  }
  0xbc   :  { %1549 = vmatprep.subr.bf16.mxu1 %v2502_v22  ;;  %v2592_v22 = vld [vmem:[#allocation5 + $0x50c] ss:$16 sps:$4 sm:$0xff]  }
  0xbe   :  { %1500 = vmatmul.mubr.bf16.vlgmr.msra.gmra.mxu1 %v2791_v6  ;;  %1513 = vmatpush1.bf16.msra.mxu0 %v2503_v25  ;;  %v2529_v6 = vld [vmem:[#allocation5 + $0x22c] ss:$16 sps:$4 sm:$0xff]  }
  0xbf   :  { %1550 = vmatpush1.bf16.msra.mxu1 %v2500_v24  ;;  %1514 = vmatprep.subr.bf16.mxu0 %v2511_v27  ;;  %v2590_v24 = vld [vmem:[#allocation5 + $0x508] ss:$16 sps:$4 sm:$0xff]   ;;  %v2594_v25 = vld [vmem:[#allocation8 + $0x38] sm:$0xff]  }
  0xc0   :  { %1551 = vmatprep.subr.bf16.mxu1 %v2508_v26  ;;  %1581 = vmatprep.mubr.bf16.mxu1 %v2807_v33  ;;  %v2530_v33 = vld [vmem:[#allocation5 + $0x448] ss:$16 sps:$4 sm:$0xff]  }
  0xc1   :  { %v2595_v26 = vld [vmem:[#allocation8 + $0x70] sm:$0xff]  }
  0xc2   :  { %1515 = vmatpush1.bf16.msra.mxu0 %v2509_v29  ;;  %v2596_v27 = vld [vmem:[#allocation8 + $0x30] sm:$0xff]   ;;  %v2599_v29 = vld [vmem:[#allocation8 + $0x60] sm:$0xff]  }
  0xc3   :  { %1552 = vmatpush1.bf16.msra.mxu1 %v2506_v28  ;;  %1516 = vmatprep.subr.bf16.mxu0 %v2517_v31  ;;  %v2597_v28 = vld [vmem:[#allocation8 + $0x68] sm:$0xff]   ;;  %v2610_v31 = vld [vmem:[#allocation8 + $0xb8] sm:$0xff]  }
  0xc4   :  { %1553 = vmatprep.subr.bf16.mxu1 %v2514_v30  ;;  %v2609_v30 = vld [vmem:[#allocation8 + $0xf8] sm:$0xff]  }
  0xc6   :  { %1517 = vmatpush1.bf16.msra.mxu0 %v2515_v34  ;;  %v2612_v34 = vld [vmem:[#allocation8 + $0xb0] sm:$0xff]  }
  0xc7   :  { %1554 = vmatpush1.bf16.msra.mxu1 %v2512_v32  ;;  %1518 = vmatprep.subr.bf16.mxu0 %v2523_v35  ;;  %v2600_v32 = vld [vmem:[#allocation8 + $0x20] sm:$0xff]   ;;  %v2614_v35 = vld [vmem:[#allocation8 + $0xa8] sm:$0xff]  }
  0xc8   :  { %1555 = vmatprep.subr.bf16.mxu1 %v2520_v51  ;;  %v2602_v51 = vld [vmem:[#allocation8 + $0x18] sm:$0xff]  }
  0xca   :  { %1519 = vmatpush1.bf16.msra.mxu0 %v2521_v37  ;;  %v2615_v37 = vld [vmem:[#allocation8 + $0xe0] sm:$0xff]  }
  0xcb   :  { %1556 = vmatpush1.bf16.msra.mxu1 %v2518_v36  ;;  %1520 = vmatprep.subr.bf16.mxu0 %v2529_v6  ;;  %v2603_v36 = vld [vmem:[#allocation8 + $0x50] sm:$0xff]   ;;  %v2605_v6 = vld [vmem:[#allocation8 + $0x48] sm:$0xff]  }
  0xcc   :  { %1557 = vmatprep.subr.bf16.mxu1 %v2526_v38  ;;  %v2604_v38 = vld [vmem:[#allocation8 + $0x10] sm:$0xff]  }
  0xce   :  { %1521 = vmatpush1.bf16.msra.mxu0 %v2527_v40  ;;  %v2607_v40 = vld [vmem:[#allocation8 + $0x40] sm:$0xff]  }
  0xcf   :  { %1558 = vmatpush1.bf16.msra.mxu1 %v2524_v39  ;;  %1522 = vmatprep.subr.bf16.mxu0 %v2535_v42  ;;  %v2606_v39 = vld [vmem:[#allocation8 + $0x8] sm:$0xff]   ;;  %v2616_v42 = vld [vmem:[#allocation8 + $0xa0] sm:$0xff]  }
  0xd0   :  { %1559 = vmatprep.subr.bf16.mxu1 %v2532_v41  ;;  %v2608_v41 = vld [vmem:[#allocation8] sm:$0xff]  }
  0xd2   :  { %1523 = vmatpush1.bf16.msra.mxu0 %v2533_v43 }
  0xd3   :  { %1560 = vmatpush1.bf16.msra.mxu1 %v2530_v33  ;;  %1524 = vmatprep.subr.bf16.mxu0 %v2541_v45 }
  0xd4   :  { %1561 = vmatprep.subr.bf16.mxu1 %v2538_v44 }
  0xd6   :  { %1525 = vmatpush2.bf16.msra.mxu0 %v2539_v47  ;;  %v2618_v47 = vld [vmem:[#allocation8 + $0x98] sm:$0xff]  }
  0xd7   :  { %1562 = vmatpush1.bf16.msra.mxu1 %v2536_v46  ;;  %1526 = vmatprep.subr.bf16.mxu0 %v2547_v49  ;;  %v2617_v46 = vld [vmem:[#allocation8 + $0xd8] sm:$0xff]  }
  0xd8   :  { %1563 = vmatprep.subr.bf16.mxu1 %v2544_v48 }
  0xda   :  { %1527 = vmatpush2.bf16.msra.mxu0 %v2545_v52 }
  0xdb   :  { %1564 = vmatpush1.bf16.msra.mxu1 %v2542_v50  ;;  %1528 = vmatprep.subr.bf16.mxu0 %v2553_v54  ;;  %v2620_v54 = vld [vmem:[#allocation8 + $0x90] sm:$0xff]  }
  0xdc   :  { %1565 = vmatprep.subr.bf16.mxu1 %v2550_v53  ;;  %v2619_v53 = vld [vmem:[#allocation8 + $0xd0] sm:$0xff]  }
  0xde   :  { %1529 = vmatpush2.bf16.msra.mxu0 %v2551_v56 }
  0xdf   :  { %1566 = vmatpush2.bf16.msra.mxu1 %v2548_v55  ;;  %1530 = vmatprep.subr.bf16.mxu0 %v2559_v58  ;;  %v2622_v58 = vld [vmem:[#allocation8 + $0x88] sm:$0xff]  }
  0xe0   :  { %1567 = vmatprep.subr.bf16.mxu1 %v2556_v57  ;;  %v2621_v57 = vld [vmem:[#allocation8 + $0xc8] sm:$0xff]  }
  0xe2   :  { %1531 = vmatpush2.bf16.msra.mxu0 %v2557_v60 }
  0xe3   :  { %1568 = vmatpush2.bf16.msra.mxu1 %v2554_v59  ;;  %1532 = vmatprep.subr.bf16.mxu0 %v2565_v62  ;;  %v2624_v62 = vld [vmem:[#allocation8 + $0x80] sm:$0xff]  }
  0xe4   :  { %1569 = vmatprep.subr.bf16.mxu1 %v2562_v61  ;;  %v2623_v61 = vld [vmem:[#allocation8 + $0xc0] sm:$0xff]  }
  0xe6   :  { %1533 = vmatpush2.bf16.msra.mxu0 %v2563_v0 }
  0xe7   :  { %1570 = vmatpush2.bf16.msra.mxu1 %v2560_v63  ;;  %1534 = vmatprep.subr.bf16.mxu0 %v2571_v2  ;;  %v275_v63 = vlaneseq  ;;  %v273_v2 = vld [vmem:[#allocation7] sm:$0xf] }
  0xe8   :  { %1571 = vmatprep.subr.bf16.mxu1 %v2568_v1 }
  0xe9   :  { %v276_v0 = vshrl.u32 %v275_v63, 7 }
  0xea   :  { %1535 = vmatpush2.bf16.msra.mxu0 %v2569_v4 }
  0xeb   :  { %1572 = vmatpush2.bf16.msra.mxu1 %v2566_v3  ;;  %1536 = vmatprep.subr.bf16.mxu0 %v2577_v8  ;;  %v277_v1 = vsub.s32 0, %v276_v0  ;;  %v281_v3 = vsub.s32 1, %v276_v0 }
  0xec   :  { %1573 = vmatprep.subr.bf16.mxu1 %v2574_v5 }
  0xed   :  { %v278_v4 = vrot.slane %v273_v2, %v277_v1  ;;  %v282_v5 = vrot.slane %v273_v2, %v281_v3 }
  0xee   :  { %1537 = vmatpush2.bf16.msra.mxu0 %v2575_v10 }
  0xef   :  { %1574 = vmatpush2.bf16.msra.mxu1 %v2572_v9  ;;  %1538 = vmatprep.subr.bf16.mxu0 %v2583_v12 }
  0xf0   :  { %1575 = vmatprep.subr.bf16.mxu1 %v2580_v11 }
  0xf2   :  { %1539 = vmatpush2.bf16.msra.mxu0 %v2581_v16 }
  0xf3   :  { %1576 = vmatpush2.bf16.msra.mxu1 %v2578_v15  ;;  %1604 = vmatprep.subr.bf16.mxu0 %v2589_v19 }
  0xf4   :  { %1577 = vmatprep.subr.bf16.mxu1 %v2586_v18 }
  0xf5   :  { %1541 = vmatmul.mubr.bf16.vlgmr.msra.gmra.mxu0 %v2793_v7  ;;  %v2598_v7 = vld [vmem:[#allocation8 + $0x28] sm:$0xff]  }
  0xf6   :  { %1605 = vmatpush1.bf16.msra.mxu0 %v2587_v21  ;;  %1622 = vmatprep.mubr.bf16.mxu0 %v2741_v13  ;;  %v2611_v13 = vld [vmem:[#allocation8 + $0xf0] sm:$0xff]  }
  0xf7   :  { %1578 = vmatpush2.bf16.msra.mxu1 %v2584_v20  ;;  %2238 = vmatprep.subr.bf16.mxu0 %v2593_v23 }
  0xf8   :  { %1579 = vmatprep.subr.bf16.mxu1 %v2592_v22 }
  0xfb   :  { %1580 = vmatpush2.bf16.msra.mxu1 %v2590_v24 }
  0xfc   :  { %2260 = vmatprep.subr.bf16.mxu1 %v2609_v30  ;;  %v285_v30 = vsub.s32 2, %v276_v0 }
  0xfd   :  { %2204 = vmatmul.mubr.msk.bf16.vlgmr.msra.gmra.mxu0 %vm1299_vm0, %v2798_v17  ;;  %v2613_v17 = vld [vmem:[#allocation8 + $0xe8] sm:$0xff]  }
  0xfe   :  { %1582 = vmatmul.mubr.bf16.vlgmr.msra.gmra.mxu1 %v2812_v14  ;;  %2239 = vmatpush3.bf16.msra.mxu0 %v2594_v25  ;;  %v2601_v14 = vld [vmem:[#allocation8 + $0x58] sm:$0xff]  }
  0xff   :  { %2240 = vmatprep.subr.bf16.mxu0 %v2595_v26  ;;  %2261 = vmatpush3.bf16.msra.mxu1 %v2610_v31  ;;  %v289_v31 = vsub.s32 3, %v276_v0 }
 0x100   :  { %2262 = vmatprep.subr.bf16.mxu1 %v2611_v13 }
 0x102   :  { %2241 = vmatpush3.bf16.msra.mxu0 %v2596_v27 }
 0x103   :  { %2242 = vmatprep.subr.bf16.mxu0 %v2597_v28  ;;  %2263 = vmatpush3.bf16.msra.mxu1 %v2612_v34 }
 0x104   :  { %2264 = vmatprep.subr.bf16.mxu1 %v2613_v17 }
 0x106   :  { %2243 = vmatpush3.bf16.msra.mxu0 %v2598_v7 }
 0x107   :  { %2244 = vmatprep.subr.bf16.mxu0 %v2599_v29  ;;  %2265 = vmatpush3.bf16.msra.mxu1 %v2614_v35 }
 0x108   :  { %2266 = vmatprep.subr.bf16.mxu1 %v2615_v37 }
 0x10a   :  { %2245 = vmatpush3.bf16.msra.mxu0 %v2600_v32  ;;  %v286_v32 = vrot.slane %v273_v2, %v285_v30 }
 0x10b   :  { %2246 = vmatprep.subr.bf16.mxu0 %v2601_v14  ;;  %2267 = vmatpush3.bf16.msra.mxu1 %v2616_v42  ;;  %v290_v14 = vrot.slane %v273_v2, %v289_v31 }
 0x10c   :  { %2268 = vmatprep.subr.bf16.mxu1 %v2617_v46 }
 0x10e   :  { %2247 = vmatpush3.bf16.msra.mxu0 %v2602_v51 }
 0x10f   :  { %2248 = vmatprep.subr.bf16.mxu0 %v2603_v36  ;;  %2269 = vmatpush3.bf16.msra.mxu1 %v2618_v47 }
 0x110   :  { %2270 = vmatprep.subr.bf16.mxu1 %v2619_v53 }
 0x112   :  { %2249 = vmatpush3.bf16.msra.mxu0 %v2604_v38 }
 0x113   :  { %2250 = vmatprep.subr.bf16.mxu0 %v2605_v6  ;;  %2271 = vmatpush3.bf16.msra.mxu1 %v2620_v54 }
 0x114   :  { %2272 = vmatprep.subr.bf16.mxu1 %v2621_v57 }
 0x116   :  { %2251 = vmatpush3.bf16.msra.mxu0 %v2606_v39 }
 0x117   :  { %2252 = vmatprep.subr.bf16.mxu0 %v2607_v40  ;;  %2273 = vmatpush3.bf16.msra.mxu1 %v2622_v58 }
 0x118   :  { %2274 = vmatprep.subr.bf16.mxu1 %v2623_v61 }
 0x11a   :  { %2253 = vmatpush3.bf16.msra.mxu0 %v2608_v41 }
 0x11b   :  { %2275 = vmatpush3.bf16.msra.mxu1 %v2624_v62 }
 0x135   :  { %v1337_v33 = vpop.f32.mrf.mxu0 }
 0x136   :  { %v1378_v43 = vpop.f32.mrf.mxu1  ;;  %v1338_v8 = vadd.f32 %v1337_v33, %v278_v4 }
 0x137   :  { %v1339_v44 = vpop.f32.mrf.mxu0 }
 0x138   :  { %v1380_v45 = vpop.f32.mrf.mxu1  ;;  %v1340_v9 = vadd.f32 %v1339_v44, %v282_v5  ;;  %v1379_v10 = vadd.f32 %v1378_v43, %v1338_v8 }
 0x139   :  { %v1341_v48 = vpop.f32.mrf.mxu0 }
 0x13a   :  { %v1382_v49 = vpop.f32.mrf.mxu1  ;;  %v1381_v12 = vadd.f32 %v1380_v45, %v1340_v9 }
 0x13b   :  { %v1342_v50 = vpop.f32.mrf.mxu0 }
 0x13c   :  { %v1383_v52 = vpop.f32.mrf.mxu1 }
 0x13e   :  { %v1460_v55 = vpop.f32.mrf.mxu1 }
 0x140   :  { %v1462_v56 = vpop.f32.mrf.mxu1 }
 0x142   :  { %v1464_v59 = vpop.f32.mrf.mxu1 }
 0x143   :  { %v2205_v59 = vld [vmem:[%s2833_s4] ss:$0 sm:$0xff] }
 0x144   :  { %v1465_v60 = vpop.f32.mrf.mxu1 }
 0x175   :  { %v1419_v11 = vpop.f32.mrf.mxu0 }
 0x176   :  { %v1420_v15 = vadd.f32 %v1419_v11, %v1379_v10 }
 0x177   :  { %v1421_v16 = vpop.f32.mrf.mxu0 }
 0x178   :  { %v1461_v18 = vadd.f32 %v1460_v55, %v1420_v15  ;;  %v1422_v19 = vadd.f32 %v1421_v16, %v1381_v12 }
 0x179   :  { %v1423_v20 = vpop.f32.mrf.mxu0 }
 0x17a   :  { %v1463_v21 = vadd.f32 %v1462_v56, %v1422_v19  ;;  %v1631_v22 = vmax.f32 %v1461_v18, 0.0 }
 0x17b   :  { %v1424_v23 = vpop.f32.mrf.mxu0 }
 0x17c   :  { %v1632_v24 = vmax.f32 %v1463_v21, 0.0  ;;  %v1635_v27 = vpack.c.bf16 %v1631_v22, %v1631_v22 }
 0x17e   :  { %v1501_v25 = vpop.f32.mrf.mxu1  ;;  %v1636_v26 = vpack.c.bf16 %v1632_v24, %v1632_v24 }
 0x17f   :  { %v1502_v51 = vadd.f32 %v1501_v25, %v286_v32 }
 0x180   :  { %v1503_v28 = vpop.f32.mrf.mxu1  ;;  %1934 = vmatprep.mubr.bf16.mxu0 %v1636_v26 }
 0x181   :  { %1935 = vmatmul.mubr.bf16.vlgmr.msra.gmra.mxu0 %v1635_v27  ;;  %v1504_v36 = vadd.f32 %v1503_v28, %v290_v14 }
 0x182   :  { %v1505_v7 = vpop.f32.mrf.mxu1 }
 0x184   :  { %v1506_v29 = vpop.f32.mrf.mxu1 }
 0x1b5   :  { %v1542_v13 = vpop.f32.mrf.mxu0 }
 0x1b6   :  { %v1543_v37 = vadd.f32 %v1542_v13, %v1502_v51 }
 0x1b7   :  { %v1544_v34 = vpop.f32.mrf.mxu0 }
 0x1b8   :  { %v1545_v39 = vadd.f32 %v1544_v34, %v1504_v36 }
 0x1b9   :  { %v1546_v17 = vpop.f32.mrf.mxu0 }
 0x1bb   :  { %v1547_v35 = vpop.f32.mrf.mxu0 }
 0x1bd   :  { %v1624_v6 = vpop.f32.mrf.mxu0 }
 0x1be   :  { %v1583_v38 = vpop.f32.mrf.mxu1 }
 0x1bf   :  { %v1584_v40 = vadd.f32 %v1583_v38, %v1543_v37  ;;  %v1626_v42 = vpop.f32.mrf.mxu0 }
 0x1c0   :  { %v1585_v41 = vpop.f32.mrf.mxu1 }
 0x1c1   :  { %v1625_v33 = vadd.f32 %v1624_v6, %v1584_v40  ;;  %v1586_v43 = vadd.f32 %v1585_v41, %v1545_v39  ;;  %v1628_v45 = vpop.f32.mrf.mxu0 }
 0x1c2   :  { %v1587_v44 = vpop.f32.mrf.mxu1 }
 0x1c3   :  { %v1627_v46 = vadd.f32 %v1626_v42, %v1586_v43  ;;  %v1633_v47 = vmax.f32 %v1625_v33, 0.0  ;;  %v1629_v49 = vpop.f32.mrf.mxu0 }
 0x1c4   :  { %v1588_v48 = vpop.f32.mrf.mxu1 }
 0x1c5   :  { %v1634_v50 = vmax.f32 %v1627_v46, 0.0  ;;  %v1637_v53 = vpack.c.bf16 %v1633_v47, %v1633_v47 }
 0x1c7   :  { %v1638_v52 = vpack.c.bf16 %v1634_v50, %v1634_v50 }
 0x1c9   :  { %1974 = vmatprep.mubr.bf16.mxu1 %v1638_v52 }
 0x1ca   :  { %1975 = vmatmul.mubr.bf16.vlgmr.msra.gmra.mxu1 %v1637_v53 }
 0x241   :  { %v2254_v54 = vpop.f32.mrf.mxu0 }
 0x243   :  { %v2255_v55 = vpop.f32.mrf.mxu0 }
 0x244   :  { %v2256_v56 = vadd.f32 %v2255_v55, %v2254_v54 }
 0x245   :  { %v2257_v57 = vpop.f32.mrf.mxu0 }
 0x246   :  { %v1937_v62 = vadd.f32 %v2256_v56, %v2205_v59 }
 0x247   :  { %v2258_v58 = vpop.f32.mrf.mxu0 }
 0x28a   :  { %v2276_v60 = vpop.f32.mrf.mxu1 }
 0x28c   :  { %v2277_v61 = vpop.f32.mrf.mxu1 }
 0x28d   :  { %v2278_v63 = vadd.f32 %v2277_v61, %v2276_v60 }
 0x28e   :  { %v2279_v0 = vpop.f32.mrf.mxu1 }
 0x28f   :  { %v1977_v1 = vadd.f32 %v2278_v63, %v1937_v62 }
 0x290   :  { %v2280_v2 = vpop.f32.mrf.mxu1 }
 0x291   :  { %1982 = vst [vmem:[#allocation10] sm:$0xff] %v1977_v1 }
 0x292   :  { %2716 = shalt.err (!%p2713_p10)
}
 0x293   :  { %1992 = dma.vmem_to_hbm [thread:$0]  %s1990_s16, 128, %s2834_s5, [#allocation4]  }
 0x294   :  { %2731 = dma.done.wait [#allocation4], 128  }
 0x295   :  { %2732 = vsyncadd [#allocation4], 4294967168 }
 0x296   :  { %1996 = vsyncpa [#allocation3], 1 }
 0x297   :  { %1997 = vsyncpa [#allocation6], 1 }
 0x298   :  { %1998 = vsyncpa [#allocation9], 1 }
 0x299   :  { %1999 = vsyncpa [#allocation4], 1 }

</bundles_post_ra>
